<compile_context>
chip_gen: v6e
topology: v6e:2x2x1
jax: 0.10.0
libtpu: 0.0.40
codegen_flags: <defaults>
</compile_context>

<pallas_src>
import functools

import jax
import jax.numpy as jnp
from jax.experimental import pallas as pl
from jax.experimental.pallas import tpu as pltpu

BN_EPS = 1e-5
FUSED_MAX_BATCH = 32768     # padded-batch cutover: fused VMEM-resident vs streaming
STREAM_TILE = 8192          # batch tile for the streaming fallback


def _round_up(n, m):
    return ((n + m - 1) // m) * m


# =============================================================================
# FUSED single-kernel path: everything VMEM-resident, one grid step.
# =============================================================================
def _fused_kernel(xT_ref, w1_ref, b1_ref, gamma_ref, beta_ref, w2_ref, b2_ref,
                  o_ref, *, batch, padded):
    # h^T = ReLU(W1 @ x^T + b1), lane-dense (H, B_pad): one MXU matmul + VPU.
    h = jnp.dot(w1_ref[...], xT_ref[...], preferred_element_type=jnp.float32)
    h = jnp.maximum(h + b1_ref[...], 0.0)                        # (H, Bp)

    # Zero-padded batch columns all evaluate to relu(b1); correct the full-batch
    # statistics analytically instead of masking every element (review item).
    n_pad = float(padded - batch)
    inv_b = 1.0 / batch
    rb = jnp.maximum(b1_ref[...], 0.0)                           # (H, 1)

    mean = (jnp.sum(h, axis=1, keepdims=True) - n_pad * rb) * inv_b        # (H, 1)
    d = h - mean
    dp = rb - mean
    # Exact centered variance (avoids E[h^2]-E[h]^2 cancellation), biased as in
    # BatchNorm1d training mode.
    var = (jnp.sum(d * d, axis=1, keepdims=True) - n_pad * dp * dp) * inv_b
    inv_std = jax.lax.rsqrt(jnp.maximum(var, 0.0) + BN_EPS)      # (H, 1)  EUP rsqrt

    # Fold BN affine + output Linear(16 -> 1) into per-feature scale a, shift c.
    g = gamma_ref[...]                                           # (H, 1)
    w2c = w2_ref[...]                                            # (H, 1)
    a = inv_std * g * w2c                                        # (H, 1)
    c = b2_ref[...] + jnp.sum((beta_ref[...] - mean * inv_std * g) * w2c,
                              axis=0, keepdims=True)             # (1, 1)

    # y = sum_f h_f * a_f + c : VPU multiply + 16-deep sublane reduce, full-lane store.
    o_ref[...] = jnp.sum(h * a, axis=0, keepdims=True) + c       # (1, Bp)


@jax.jit
def _forward_fused(x, w1, b1, gamma, beta, w2, b2):
    B, F = x.shape
    H = w1.shape[0]
    B_pad = max(128, _round_up(B, 128))      # full 128-lane rows -> unmasked stores

    xT = jnp.pad(x.astype(jnp.float32).T, ((0, 0), (0, B_pad - B)))   # (F, B_pad)
    col = lambda v: v.astype(jnp.float32).reshape(-1, 1)

    # x block + a few (H, B_pad) f32 temporaries + output row, with 2x headroom;
    # <= ~26 MiB at the FUSED_MAX_BATCH cutover, safe on v7x's 64 MiB VMEM.
    vmem = min(48 * 1024 * 1024,
               max(4 * 1024 * 1024,
                   2 * 4 * (F * B_pad + 4 * H * B_pad + 2 * B_pad + H * F + 16 * H)))

    y_row = pl.pallas_call(
        functools.partial(_fused_kernel, batch=B, padded=B_pad),
        out_shape=jax.ShapeDtypeStruct((1, B_pad), jnp.float32),
        grid_spec=pltpu.PrefetchScalarGridSpec(
            num_scalar_prefetch=0,
            grid=(1,),
            in_specs=[
                pl.BlockSpec((F, B_pad), lambda i: (0, 0)),      # x^T
                pl.BlockSpec((H, F), lambda i: (0, 0)),          # W1
                pl.BlockSpec((H, 1), lambda i: (0, 0)),          # b1
                pl.BlockSpec((H, 1), lambda i: (0, 0)),          # gamma
                pl.BlockSpec((H, 1), lambda i: (0, 0)),          # beta
                pl.BlockSpec((H, 1), lambda i: (0, 0)),          # w2
                pl.BlockSpec((1, 1), lambda i: (0, 0)),          # b2
            ],
            out_specs=pl.BlockSpec((1, B_pad), lambda i: (0, 0)),
        ),
        compiler_params=pltpu.CompilerParams(
            dimension_semantics=("arbitrary",),
            vmem_limit_bytes=vmem,
        ),
        cost_estimate=pl.CostEstimate(
            flops=2 * B_pad * F * H + 12 * B_pad * H,
            transcendentals=H,
            bytes_accessed=4 * (F * B_pad + B_pad + H * F + 8 * H),
        ),
    )(xT, w1.astype(jnp.float32), col(b1), col(gamma), col(beta), col(w2), col(b2))

    return y_row.reshape(B_pad, 1)[:B]       # back to PyTorch (B, 1) layout


# =============================================================================
# STREAMING two-pass fallback for very large batches (h^T doesn't fit VMEM).
# =============================================================================
def _hidden_stats_kernel(xT_ref, w1_ref, b1_ref, hT_ref, sum_ref, sumsq_ref):
    # No per-step padding mask (review item): padded columns contribute relu(b1),
    # corrected exactly in the JAX finalization.
    h = jnp.dot(w1_ref[...], xT_ref[...], preferred_element_type=jnp.float32)
    h = jnp.maximum(h + b1_ref[...], 0.0)                        # (H, TB)
    hT_ref[...] = h                                              # stash for pass 2
    sum_ref[0] = jnp.sum(h, axis=1, keepdims=True)               # (H, 1)
    sumsq_ref[0] = jnp.sum(h * h, axis=1, keepdims=True)         # (H, 1)
    # NOTE: stat writes kept as two separate (known-good) outputs; each is a tiny
    # per-step DMA and merging them is a low-priority polish per the review.


def _bn_out_kernel(hT_ref, a_ref, c_ref, o_ref):
    y = jnp.sum(hT_ref[...] * a_ref[...], axis=0, keepdims=True)  # (1, TB)
    o_ref[...] = y + c_ref[...]


@jax.jit
def _forward_streaming(x, w1, b1, gamma, beta, w2, b2):
    B, F = x.shape
    H = w1.shape[0]

    # Big batch tile: ~1.5 MiB moved per grid step instead of ~96 KiB, so the
    # ~0.35 us fixed per-step overhead no longer dominates.  Lane width is a
    # multiple of 128 (unmasked stores).
    TB = STREAM_TILE if B >= STREAM_TILE else max(128, _round_up(B, 128))
    n_tiles = -(-B // TB)
    if n_tiles > 1 and n_tiles % 2:
        n_tiles += 1                          # v7x megacore: keep tile count even
    B_pad = n_tiles * TB

    xT = jnp.pad(x.astype(jnp.float32).T, ((0, 0), (0, B_pad - B)))   # (F, B_pad)
    w1_f = w1.astype(jnp.float32)
    b1_col = b1.astype(jnp.float32).reshape(H, 1)

    vmem1 = min(48 * 1024 * 1024,
                max(4 * 1024 * 1024,
                    3 * 4 * (2 * F * TB + 4 * H * TB + H * F + 8 * H)))

    # ---- Pass 1: hidden activations + per-tile BN partial statistics ------------
    hT, psum, psumsq = pl.pallas_call(
        _hidden_stats_kernel,
        out_shape=(
            jax.ShapeDtypeStruct((H, B_pad), jnp.float32),
            jax.ShapeDtypeStruct((n_tiles, H, 1), jnp.float32),
            jax.ShapeDtypeStruct((n_tiles, H, 1), jnp.float32),
        ),
        grid_spec=pltpu.PrefetchScalarGridSpec(
            num_scalar_prefetch=0,
            grid=(n_tiles,),
            in_specs=[
                pl.BlockSpec((F, TB), lambda i: (0, i)),         # x^T tile (pipelined)
                pl.BlockSpec((H, F), lambda i: (0, 0)),          # W1 (replicated)
                pl.BlockSpec((H, 1), lambda i: (0, 0)),          # b1 (replicated)
            ],
            out_specs=(
                pl.BlockSpec((H, TB), lambda i: (0, i)),         # h stash
                pl.BlockSpec((1, H, 1), lambda i: (i, 0, 0)),    # per-tile sum
                pl.BlockSpec((1, H, 1), lambda i: (i, 0, 0)),    # per-tile sum of sq.
            ),
        ),
        compiler_params=pltpu.CompilerParams(
            dimension_semantics=("parallel",), vmem_limit_bytes=vmem1),
        cost_estimate=pl.CostEstimate(
            flops=2 * B_pad * F * H + 4 * B_pad * H,
            transcendentals=0,
            bytes_accessed=4 * (F * B_pad + H * B_pad + H * F + H + 2 * H * n_tiles),
        ),
    )(xT, w1_f, b1_col)

    # ---- Finalize full-batch stats (pad-corrected); fold BN + output Linear -----
    n_pad = float(B_pad - B)
    rb = jnp.maximum(b1.astype(jnp.float32), 0.0)                # h of a padded column
    s = jnp.sum(psum[:, :, 0], axis=0) - n_pad * rb              # (H,)
    ss = jnp.sum(psumsq[:, :, 0], axis=0) - n_pad * rb * rb      # (H,)
    mean = s / B
    # TODO(synk): E[h^2]-E[h]^2 in f32 can cancel for large-mean/small-var features;
    # switch to per-tile Welford combine if that regime matters.
    var = jnp.maximum(ss / B - mean * mean, 0.0)                 # biased (BN training)
    inv_std = jax.lax.rsqrt(var + BN_EPS)
    gamma_f = gamma.astype(jnp.float32)
    beta_f = beta.astype(jnp.float32)
    w2_col = w2.astype(jnp.float32).reshape(-1)                  # (H,)
    scale = inv_std * gamma_f * w2_col                           # per-feature a
    shift = b2.astype(jnp.float32).reshape(()) + jnp.sum(
        (beta_f - mean * inv_std * gamma_f) * w2_col)            # scalar c

    vmem2 = min(48 * 1024 * 1024,
                max(4 * 1024 * 1024, 3 * 4 * (2 * H * TB + 4 * TB + 4 * H)))

    # ---- Pass 2: y = sum_f h_f * a_f + c over h tiles ----------------------------
    y_row = pl.pallas_call(
        _bn_out_kernel,
        out_shape=jax.ShapeDtypeStruct((1, B_pad), jnp.float32),
        grid_spec=pltpu.PrefetchScalarGridSpec(
            num_scalar_prefetch=0,
            grid=(n_tiles,),
            in_specs=[
                pl.BlockSpec((H, TB), lambda i: (0, i)),         # h tile (pipelined)
                pl.BlockSpec((H, 1), lambda i: (0, 0)),          # folded scale
                pl.BlockSpec((1, 1), lambda i: (0, 0)),          # folded shift
            ],
            out_specs=pl.BlockSpec((1, TB), lambda i: (0, i)),   # lane-dense output row
        ),
        compiler_params=pltpu.CompilerParams(
            dimension_semantics=("parallel",), vmem_limit_bytes=vmem2),
        cost_estimate=pl.CostEstimate(
            flops=2 * B_pad * H,
            transcendentals=0,
            bytes_accessed=4 * (H * B_pad + B_pad + H + 1),
        ),
    )(hT, scale.reshape(H, 1), shift.reshape(1, 1))

    return y_row.reshape(B_pad, 1)[:B]


# =============================================================================
# Public wrapper + reference + init
# =============================================================================
def linear_model_forward(x, w1, b1, gamma, beta, w2, b2):
    """x: (B, in_features) f32; params in PyTorch layout.  Returns (B, 1) f32."""
    if x.shape[0] <= FUSED_MAX_BATCH:
        return _forward_fused(x, w1, b1, gamma, beta, w2, b2)
    return _forward_streaming(x, w1, b1, gamma, beta, w2, b2)


def init_params(key, in_features, hidden=16):
    """Deterministic PyTorch-style init: U(-1/sqrt(fan_in), 1/sqrt(fan_in))."""
    k1, k2, k3, k4 = jax.random.split(key, 4)
    bound1 = 1.0 / jnp.sqrt(in_features)
    w1 = jax.random.uniform(k1, (hidden, in_features), jnp.float32, -bound1, bound1)
    b1 = jax.random.uniform(k2, (hidden,), jnp.float32, -bound1, bound1)
    gamma = jnp.ones((hidden,), jnp.float32)     # BatchNorm1d weight
    beta = jnp.zeros((hidden,), jnp.float32)     # BatchNorm1d bias
    bound2 = 1.0 / jnp.sqrt(hidden)
    w2 = jax.random.uniform(k3, (1, hidden), jnp.float32, -bound2, bound2)
    b2 = jax.random.uniform(k4, (1,), jnp.float32, -bound2, bound2)
    return w1, b1, gamma, beta, w2, b2


def _reference(x, w1, b1, gamma, beta, w2, b2):
    h = jnp.maximum(x @ w1.T + b1, 0.0)
    mean = jnp.mean(h, axis=0, keepdims=True)
    var = jnp.mean((h - mean) ** 2, axis=0, keepdims=True)   # biased, like BN training
    hn = (h - mean) / jnp.sqrt(var + BN_EPS) * gamma + beta
    return hn @ w2.T + b2


if __name__ == "__main__":
    key = jax.random.PRNGKey(0)
    k_in, k_p, k_in2 = jax.random.split(key, 3)

    # Small shape consistent with the module: batch=8, in_features=32, hidden=16.
    B, F, H = 8, 32, 16
    x = jax.random.normal(k_in, (B, F), jnp.float32)
    params = init_params(k_p, F, H)

    out = jax.block_until_ready(linear_model_forward(x, *params))
    ref = _reference(x, *params)
    assert out.shape == (B, 1), out.shape
    assert jnp.allclose(out, ref, atol=1e-4, rtol=1e-4), float(jnp.max(jnp.abs(out - ref)))

    # Larger batch (still the fused, fully VMEM-resident path) with batch padding.
    B2 = 1000
    x2 = jax.random.normal(k_in2, (B2, F), jnp.float32)
    out2 = jax.block_until_ready(linear_model_forward(x2, *params))
    ref2 = _reference(x2, *params)
    assert out2.shape == (B2, 1), out2.shape
    assert jnp.allclose(out2, ref2, atol=5e-4, rtol=5e-4), float(jnp.max(jnp.abs(out2 - ref2)))

    # Also exercise the large-batch streaming (two-pass pipelined) fallback path.
    out3 = jax.block_until_ready(_forward_streaming(x2, *params))
    assert out3.shape == (B2, 1), out3.shape
    assert jnp.allclose(out3, ref2, atol=5e-4, rtol=5e-4), float(jnp.max(jnp.abs(out3 - ref2)))

    print("KERNEL_OK")
</pallas_src>

<mosaic_0001>
module attributes {stable_mosaic.version = 11 : i64} {
  func.func @_fused_kernel(%arg0: i32, %arg1: memref<32x128xf32, #tpu.memory_space<vmem>>, %arg2: memref<16x32xf32, #tpu.memory_space<vmem>>, %arg3: memref<16x1xf32, #tpu.memory_space<vmem>>, %arg4: memref<16x1xf32, #tpu.memory_space<vmem>>, %arg5: memref<16x1xf32, #tpu.memory_space<vmem>>, %arg6: memref<16x1xf32, #tpu.memory_space<vmem>>, %arg7: memref<1x1xf32, #tpu.memory_space<vmem>>, %arg8: memref<1x128xf32, #tpu.memory_space<vmem>>) attributes {dimension_semantics = [#tpu.dimension_semantics<arbitrary>], iteration_bounds = array<i64: 1>, scalar_prefetch = 0 : i64, scratch_operands = 0 : i64, tpu.core_type = #tpu.core_type<tc>, window_params = [{pipeline_mode = #tpu.pipeline_mode<synchronous>, transform_indices = @transform_0, window_bounds = array<i64: 32, 128>}, {pipeline_mode = #tpu.pipeline_mode<synchronous>, transform_indices = @transform_1, window_bounds = array<i64: 16, 32>}, {pipeline_mode = #tpu.pipeline_mode<synchronous>, transform_indices = @transform_2, window_bounds = array<i64: 16, 1>}, {pipeline_mode = #tpu.pipeline_mode<synchronous>, transform_indices = @transform_3, window_bounds = array<i64: 16, 1>}, {pipeline_mode = #tpu.pipeline_mode<synchronous>, transform_indices = @transform_4, window_bounds = array<i64: 16, 1>}, {pipeline_mode = #tpu.pipeline_mode<synchronous>, transform_indices = @transform_5, window_bounds = array<i64: 16, 1>}, {pipeline_mode = #tpu.pipeline_mode<synchronous>, transform_indices = @transform_6, window_bounds = array<i64: 1, 1>}, {pipeline_mode = #tpu.pipeline_mode<synchronous>, transform_indices = @transform_7, window_bounds = array<i64: 1, 128>}]} {
    %c0 = arith.constant 0 : index
    %c0_0 = arith.constant 0 : index
    %0 = vector.load %arg2[%c0, %c0_0] : memref<16x32xf32, #tpu.memory_space<vmem>>, vector<16x32xf32>
    %c0_1 = arith.constant 0 : index
    %c0_2 = arith.constant 0 : index
    %1 = vector.load %arg1[%c0_1, %c0_2] : memref<32x128xf32, #tpu.memory_space<vmem>>, vector<32x128xf32>
    %cst = arith.constant dense<0.000000e+00> : vector<16x128xf32>
    %2 = tpu.matmul %0, %1, %cst {dimension_numbers = #tpu.dot_dimension_numbers<[1], [0], [0], [1], [0, 0, 1, 1], [], []>} : vector<16x32xf32>, vector<32x128xf32>, vector<16x128xf32> -> vector<16x128xf32>
    %c0_3 = arith.constant 0 : index
    %c0_4 = arith.constant 0 : index
    %3 = vector.load %arg3[%c0_3, %c0_4] : memref<16x1xf32, #tpu.memory_space<vmem>>, vector<16x1xf32>
    %4 = vector.broadcast %3 : vector<16x1xf32> to vector<16x128xf32>
    %5 = arith.addf %2, %4 : vector<16x128xf32>
    %cst_5 = arith.constant 0.000000e+00 : f32
    %6 = vector.broadcast %cst_5 : f32 to vector<16x128xf32>
    %7 = arith.maximumf %5, %6 : vector<16x128xf32>
    %c0_6 = arith.constant 0 : index
    %c0_7 = arith.constant 0 : index
    %8 = vector.load %arg3[%c0_6, %c0_7] : memref<16x1xf32, #tpu.memory_space<vmem>>, vector<16x1xf32>
    %cst_8 = arith.constant 0.000000e+00 : f32
    %9 = vector.broadcast %cst_8 : f32 to vector<16x1xf32>
    %10 = arith.maximumf %8, %9 : vector<16x1xf32>
    %cst_9 = arith.constant dense<0.000000e+00> : vector<16xf32>
    %11 = vector.multi_reduction <add>, %7, %cst_9 [1] : vector<16x128xf32> to vector<16xf32>
    %12 = vector.shape_cast %11 : vector<16xf32> to vector<16x1xf32>
    %cst_10 = arith.constant 1.200000e+02 : f32
    %13 = vector.broadcast %cst_10 : f32 to vector<16x1xf32>
    %14 = arith.mulf %13, %10 : vector<16x1xf32>
    %15 = arith.subf %12, %14 : vector<16x1xf32>
    %cst_11 = arith.constant 1.250000e-01 : f32
    %16 = vector.broadcast %cst_11 : f32 to vector<16x1xf32>
    %17 = arith.mulf %15, %16 : vector<16x1xf32>
    %18 = vector.broadcast %17 : vector<16x1xf32> to vector<16x128xf32>
    %19 = arith.subf %7, %18 : vector<16x128xf32>
    %20 = arith.subf %10, %17 : vector<16x1xf32>
    %21 = arith.mulf %19, %19 : vector<16x128xf32>
    %cst_12 = arith.constant dense<0.000000e+00> : vector<16xf32>
    %22 = vector.multi_reduction <add>, %21, %cst_12 [1] : vector<16x128xf32> to vector<16xf32>
    %23 = vector.shape_cast %22 : vector<16xf32> to vector<16x1xf32>
    %cst_13 = arith.constant 1.200000e+02 : f32
    %24 = vector.broadcast %cst_13 : f32 to vector<16x1xf32>
    %25 = arith.mulf %24, %20 : vector<16x1xf32>
    %26 = arith.mulf %25, %20 : vector<16x1xf32>
    %27 = arith.subf %23, %26 : vector<16x1xf32>
    %cst_14 = arith.constant 1.250000e-01 : f32
    %28 = vector.broadcast %cst_14 : f32 to vector<16x1xf32>
    %29 = arith.mulf %27, %28 : vector<16x1xf32>
    %cst_15 = arith.constant 0.000000e+00 : f32
    %30 = vector.broadcast %cst_15 : f32 to vector<16x1xf32>
    %31 = arith.maximumf %29, %30 : vector<16x1xf32>
    %cst_16 = arith.constant 9.99999974E-6 : f32
    %32 = vector.broadcast %cst_16 : f32 to vector<16x1xf32>
    %33 = arith.addf %31, %32 : vector<16x1xf32>
    %34 = math.rsqrt %33 : vector<16x1xf32>
    %c0_17 = arith.constant 0 : index
    %c0_18 = arith.constant 0 : index
    %35 = vector.load %arg4[%c0_17, %c0_18] : memref<16x1xf32, #tpu.memory_space<vmem>>, vector<16x1xf32>
    %c0_19 = arith.constant 0 : index
    %c0_20 = arith.constant 0 : index
    %36 = vector.load %arg6[%c0_19, %c0_20] : memref<16x1xf32, #tpu.memory_space<vmem>>, vector<16x1xf32>
    %37 = arith.mulf %34, %35 : vector<16x1xf32>
    %38 = arith.mulf %37, %36 : vector<16x1xf32>
    %c0_21 = arith.constant 0 : index
    %c0_22 = arith.constant 0 : index
    %39 = vector.load %arg7[%c0_21, %c0_22] : memref<1x1xf32, #tpu.memory_space<vmem>>, vector<1x1xf32>
    %c0_23 = arith.constant 0 : index
    %c0_24 = arith.constant 0 : index
    %40 = vector.load %arg5[%c0_23, %c0_24] : memref<16x1xf32, #tpu.memory_space<vmem>>, vector<16x1xf32>
    %41 = arith.mulf %17, %34 : vector<16x1xf32>
    %42 = arith.mulf %41, %35 : vector<16x1xf32>
    %43 = arith.subf %40, %42 : vector<16x1xf32>
    %44 = arith.mulf %43, %36 : vector<16x1xf32>
    %cst_25 = arith.constant dense<0.000000e+00> : vector<1xf32>
    %45 = vector.multi_reduction <add>, %44, %cst_25 [0] : vector<16x1xf32> to vector<1xf32>
    %46 = vector.shape_cast %45 : vector<1xf32> to vector<1x1xf32>
    %47 = arith.addf %39, %46 : vector<1x1xf32>
    %48 = vector.broadcast %38 : vector<16x1xf32> to vector<16x128xf32>
    %49 = arith.mulf %7, %48 : vector<16x128xf32>
    %cst_26 = arith.constant dense<0.000000e+00> : vector<128xf32>
    %50 = vector.multi_reduction <add>, %49, %cst_26 [0] : vector<16x128xf32> to vector<128xf32>
    %51 = vector.shape_cast %50 : vector<128xf32> to vector<1x128xf32>
    %52 = vector.broadcast %47 : vector<1x1xf32> to vector<1x128xf32>
    %53 = arith.addf %51, %52 : vector<1x128xf32>
    %c0_27 = arith.constant 0 : index
    %c0_28 = arith.constant 0 : index
    %54 = vector.load %arg8[%c0_27, %c0_28] : memref<1x128xf32, #tpu.memory_space<vmem>>, vector<1x128xf32>
    tpu.vector_store %arg8[%c0_27, %c0_28], %53 {strides = array<i32>} : memref<1x128xf32, #tpu.memory_space<vmem>>, vector<1x128xf32>,
    return
  }
  func.func @transform_0(%arg0: i32) -> (i32, i32) {
    %c0_i32 = arith.constant 0 : i32
    %c0_i32_0 = arith.constant 0 : i32
    %c0_i32_1 = arith.constant 0 : i32
    return %c0_i32, %c0_i32_0 : i32, i32
  }
  func.func @transform_1(%arg0: i32) -> (i32, i32) {
    %c0_i32 = arith.constant 0 : i32
    %c0_i32_0 = arith.constant 0 : i32
    %c0_i32_1 = arith.constant 0 : i32
    return %c0_i32, %c0_i32_0 : i32, i32
  }
  func.func @transform_2(%arg0: i32) -> (i32, i32) {
    %c0_i32 = arith.constant 0 : i32
    %c0_i32_0 = arith.constant 0 : i32
    %c0_i32_1 = arith.constant 0 : i32
    return %c0_i32, %c0_i32_0 : i32, i32
  }
  func.func @transform_3(%arg0: i32) -> (i32, i32) {
    %c0_i32 = arith.constant 0 : i32
    %c0_i32_0 = arith.constant 0 : i32
    %c0_i32_1 = arith.constant 0 : i32
    return %c0_i32, %c0_i32_0 : i32, i32
  }
  func.func @transform_4(%arg0: i32) -> (i32, i32) {
    %c0_i32 = arith.constant 0 : i32
    %c0_i32_0 = arith.constant 0 : i32
    %c0_i32_1 = arith.constant 0 : i32
    return %c0_i32, %c0_i32_0 : i32, i32
  }
  func.func @transform_5(%arg0: i32) -> (i32, i32) {
    %c0_i32 = arith.constant 0 : i32
    %c0_i32_0 = arith.constant 0 : i32
    %c0_i32_1 = arith.constant 0 : i32
    return %c0_i32, %c0_i32_0 : i32, i32
  }
  func.func @transform_6(%arg0: i32) -> (i32, i32) {
    %c0_i32 = arith.constant 0 : i32
    %c0_i32_0 = arith.constant 0 : i32
    %c0_i32_1 = arith.constant 0 : i32
    return %c0_i32, %c0_i32_0 : i32, i32
  }
  func.func @transform_7(%arg0: i32) -> (i32, i32) {
    %c0_i32 = arith.constant 0 : i32
    %c0_i32_0 = arith.constant 0 : i32
    %c0_i32_1 = arith.constant 0 : i32
    return %c0_i32, %c0_i32_0 : i32, i32
  }
}

</mosaic_0001>

<bundles_post_ra>
// kernel: _forward_fused.1
= control target key start
LH: loop header
LB: loop body
LE: loop exit
PB: predicated region body
PF: predicated region fallthrough
CT: control target
= control target key end

     0   :  { %vm46_vm0 = vcmask 261120   ;;  %v266_v2 = vmov 0   ;;  %vm195_vm1 = vcmask 7168   ;;  %s367_s0 = inlined_call_operand.vmem [shape: f32[32,128], index: 0, kind: input, shape index: {}]   ;;  %s368_s1 = inlined_call_operand.vmem [shape: f32[16,32], index: 1, kind: input, shape index: {}]   ;;  %s369_s2 = inlined_call_operand.vmem [shape: f32[16,1], index: 2, kind: input, shape index: {}]   ;;  %s370_s6 = inlined_call_operand.<no memory space> [shape: f32[1,1], index: 6, kind: input, shape index: {}]   ;;  %s371_s3 = inlined_call_operand.vmem [shape: f32[16,1], index: 3, kind: input, shape index: {}]   ;;  %s372_s5 = inlined_call_operand.vmem [shape: f32[16,1], index: 5, kind: input, shape index: {}]   ;;  %s373_s4 = inlined_call_operand.vmem [shape: f32[16,1], index: 4, kind: input, shape index: {}]   ;;  %s374_s7 = inlined_call_operand.vmem [shape: f32[1,128], index: 7, kind: output, shape index: {}]  }
   0x1   :  { %v33_v0 = vld [vmem:[%s367_s0 + $0x18] sm:$0xff]  ;;  %v32_v1 = vld [vmem:[%s367_s0 + $0x10] sm:$0xff]  ;;  %260 = vset.pattern.permute.xlu0 %v266_v2  ;;  %261 = vset.pattern.permute.xlu1 %v266_v2  ;;  %v28_v3 = vld [vmem:[%s368_s1] sm:$0xff]  ;;  %v12_v33 = vstv %s370_s6 }
   0x2   :  { %248 = vmatprep.subr.mxu0 %v33_v0  ;;  %v31_v4 = vld [vmem:[%s367_s0 + $0x8] sm:$0xff]  ;;  %256 = vmatprep.mubr.msk.f32.mxu0 %vm46_vm0, %v28_v3  ;;  %v34_v5 = vld [vmem:[%s369_s2] sm:$0xff]  ;;  %13 = vst [vmem:[#allocation2] sm:$0x1] %v12_v33 }
   0x3   :  { %249 = vmatpush3.msra.mxu0 %v33_v0  ;;  %38 = vperm.xlu0 %260, %v34_v5   ;;  %v30_v6 = vld [vmem:[%s367_s0] sm:$0xff]  ;;  %v35_v7 = vld [vmem:[%s369_s2 + $0x8] sm:$0xff]  ;;  %v130_v17 = vmax.f32 %v34_v5, 0.0 }
   0x4   :  { %250 = vmatprep.subr.mxu0 %v32_v1  ;;  %v29_v8 = vld [vmem:[%s368_s1 + $0x8] sm:$0xff]  ;;  %v131_v18 = vmax.f32 %v35_v7, 0.0  ;;  %v176_v50 = vld [vmem:[%s371_s3] sm:$0xff] }
   0x5   :  { %251 = vmatpush3.msra.mxu0 %v32_v1  ;;  %v136_v19 = vmul.f32 120.0, %v130_v17  ;;  %v178_v52 = vld [vmem:[%s372_s5] sm:$0xff]  ;;  %v177_v56 = vld [vmem:[%s371_s3 + $0x8] sm:$0xff] }
   0x6   :  { %252 = vmatprep.subr.mxu0 %v31_v4  ;;  %v137_v22 = vmul.f32 120.0, %v131_v18  ;;  %v185_v55 = vld [vmem:[%s373_s4] sm:$0xff]  ;;  %v179_v60 = vld [vmem:[%s372_s5 + $0x8] sm:$0xff] }
   0x7   :  { %253 = vmatpush3.msra.mxu0 %v31_v4  ;;  %43 = vperm.xlu0 %260, %v35_v7   ;;  %v186_v0 = vld [vmem:[%s373_s4 + $0x8] sm:$0xff] }
   0x8   :  { %254 = vmatprep.subr.mxu0 %v30_v6 }
   0x9   :  { %255 = vmatpush3.msra.mxu0 %v30_v6 }
   0xa   :  { %257 = vmatmul.mubr.msk.f32.vlgmr.msra.gmra.mxu0 %vm46_vm0, %v29_v8 }
  0x7e   :  { %v39_v9 = vpop.permute.xlu0 %38 }
  0x82   :  { %v44_v11 = vpop.permute.xlu0 %43 }
  0xca   :  { %v258_v10 = vpop.f32.mrf.mxu0 }
  0xcb   :  { %v125_v14 = vadd.f32 %v258_v10, %v44_v11 }
  0xcc   :  { %v119_v12 = vpop.f32.mrf.mxu0 }
  0xcd   :  { %v120_v13 = vadd.f32 %v119_v12, %v39_v9  ;;  %v336_v16 = vmax.f32 %v125_v14, 0.0  ;;  %v184_v14 = vld [vmem:[#allocation2] sm:$0x1] }
  0xcf   :  { %v333_v15 = vmax.f32 %v120_v13, 0.0 }
  0xd1   :  { %132 = vadd.xlane.f32.xlu1 %v333_v15 }
  0xd5   :  { %134 = vadd.xlane.f32.xlu1 %v336_v16 }
 0x15a   :  { %v133_v20 = vpop.xlane.xlu1 %132 }
 0x15b   :  { %v138_v21 = vsub.f32 %v133_v20, %v136_v19 }
 0x15d   :  { %v140_v23 = vmul.f32 0.125, %v138_v21 }
 0x15e   :  { %v135_v24 = vpop.xlane.xlu1 %134 }
 0x15f   :  { %v139_v25 = vsub.f32 %v135_v24, %v137_v22  ;;  %144 = vperm.xlu0 %260, %v140_v23   ;;  %v154_v34 = vsub.f32 %v130_v17, %v140_v23 }
 0x161   :  { %v141_v26 = vmul.f32 0.125, %v139_v25  ;;  %v162_v35 = vmul.f32 120.0, %v154_v34 }
 0x163   :  { %149 = vperm.xlu1 %261, %v141_v26   ;;  %v155_v36 = vsub.f32 %v131_v18, %v141_v26  ;;  %v164_v37 = vmul.f32 %v162_v35, %v154_v34 }
 0x165   :  { %v163_v38 = vmul.f32 120.0, %v155_v36 }
 0x167   :  { %v165_v42 = vmul.f32 %v163_v38, %v155_v36 }
 0x1da   :  { %v145_v27 = vpop.permute.xlu0 %144 }
 0x1db   :  { %v152_v28 = vsub.f32 %v333_v15, %v145_v27  ;;  %v230_v27 = vlaneseq }
 0x1dd   :  { %v156_v29 = vmul.f32 %v152_v28, %v152_v28  ;;  %v231_v28 = vshrl.u32 %v230_v27, 7 }
 0x1de   :  { %v150_v30 = vpop.permute.xlu1 %149 }
 0x1df   :  { %v153_v31 = vsub.f32 %v336_v16, %v150_v30  ;;  %158 = vadd.xlane.f32.xlu0 %v156_v29  ;;  %v232_v30 = vsub.s32 0, %v231_v28 }
 0x1e1   :  { %v157_v32 = vmul.f32 %v153_v31, %v153_v31 }
 0x1e3   :  { %160 = vadd.xlane.f32.xlu1 %v157_v32 }
 0x268   :  { %v159_v39 = vpop.xlane.xlu0 %158 }
 0x269   :  { %v166_v40 = vsub.f32 %v159_v39, %v164_v37 }
 0x26b   :  { %v168_v41 = vmul.f32 0.125, %v166_v40 }
 0x26c   :  { %v161_v43 = vpop.xlane.xlu1 %160 }
 0x26d   :  { %v170_v44 = vmax.f32 %v168_v41, 0.0  ;;  %v167_v45 = vsub.f32 %v161_v43, %v165_v42 }
 0x26f   :  { %v172_v46 = vadd.f32 1e-05, %v170_v44  ;;  %v169_v47 = vmul.f32 0.125, %v167_v45 }
 0x271   :  { %262 = vrsqrt.f32 %v172_v46  ;;  %v171_v48 = vmax.f32 %v169_v47, 0.0 }
 0x273   :  { %v173_v49 = vadd.f32 1e-05, %v171_v48 }
 0x275   :  { %264 = vrsqrt.f32 %v173_v49 }
 0x27e   :  { %v263_v51 = vpop.eup %262 }
 0x27f   :  { %v180_v53 = vmul.f32 %v263_v51, %v176_v50  ;;  %v187_v54 = vmul.f32 %v263_v51, %v140_v23 }
 0x281   :  { %v182_v57 = vmul.f32 %v180_v53, %v178_v52  ;;  %v189_v58 = vmul.f32 %v187_v54, %v176_v50 }
 0x282   :  { %v265_v59 = vpop.eup %264 }
 0x283   :  { %v191_v61 = vsub.f32 %v185_v55, %v189_v58  ;;  %208 = vperm.xlu0 %260, %v182_v57   ;;  %v181_v62 = vmul.f32 %v265_v59, %v177_v56  ;;  %v188_v63 = vmul.f32 %v265_v59, %v141_v26 }
 0x285   :  { %v183_v1 = vmul.f32 %v181_v62, %v179_v60  ;;  %v190_v2 = vmul.f32 %v188_v63, %v177_v56  ;;  %v193_v3 = vmul.f32 %v191_v61, %v178_v52 }
 0x287   :  { %v192_v4 = vsub.f32 %v186_v0, %v190_v2  ;;  %213 = vperm.xlu1 %261, %v183_v1   ;;  %v196_v6 = vsel %vm195_vm1, %v193_v3, 0.0 }
 0x289   :  { %v194_v5 = vmul.f32 %v192_v4, %v179_v60 }
 0x28b   :  { %v197_v7 = vsel %vm195_vm1, %v194_v5, 0.0 }
 0x28c   :  { %v198_v8 = vadd.f32 %v197_v7, %v196_v6 }
 0x28e   :  { %v199_v9 = vrot.slane %v198_v8, 4 }
 0x290   :  { %v200_v10 = vadd.f32 %v199_v9, %v198_v8 }
 0x292   :  { %v201_v11 = vrot.slane %v200_v10, 2 }
 0x294   :  { %v202_v12 = vadd.f32 %v201_v11, %v200_v10 }
 0x296   :  { %v203_v13 = vrot.slane %v202_v12, 1 }
 0x298   :  { %v204_v17 = vadd.f32 %v203_v13, %v202_v12 }
 0x29a   :  { %v205_v18 = vadd.f32 %v204_v17, %v184_v14 }
 0x29c   :  { %227 = vperm.xlu0 %260, %v205_v18  }
 0x2fe   :  { %v209_v19 = vpop.permute.xlu0 %208 }
 0x2ff   :  { %v216_v21 = vmul.f32 %v209_v19, %v333_v15 }
 0x302   :  { %v214_v20 = vpop.permute.xlu1 %213 }
 0x303   :  { %v217_v22 = vmul.f32 %v214_v20, %v336_v16 }
 0x305   :  { %v218_v23 = vadd.f32 %v217_v22, %v216_v21 }
 0x307   :  { %v219_v24 = vrot.slane %v218_v23, 4 }
 0x309   :  { %v220_v25 = vadd.f32 %v219_v24, %v218_v23 }
 0x30b   :  { %v221_v26 = vrot.slane %v220_v25, 2 }
 0x30d   :  { %v222_v29 = vadd.f32 %v221_v26, %v220_v25 }
 0x30f   :  { %v223_v31 = vrot.slane %v222_v29, 1 }
 0x311   :  { %v224_v33 = vadd.f32 %v223_v31, %v222_v29 }
 0x317   :  { %v228_v32 = vpop.permute.xlu0 %227 }
 0x318   :  { %v233_v34 = vrot.slane %v228_v32, %v232_v30 }
 0x31a   :  { %v234_v35 = vadd.f32 %v233_v34, %v224_v33 }
 0x31c   :  { %235 = vst [vmem:[%s374_s7] sm:$0x1] %v234_v35 }

</bundles_post_ra>
